<compile_context>
chip_gen: v5e
topology: v5e:2x2
jax: 0.10.0
libtpu: 0.0.40
codegen_flags: <defaults>
</compile_context>

<pallas_src>
import functools
import math

import jax
import jax.numpy as jnp
from jax.experimental import pallas as pl
from jax.experimental.pallas import tpu as pltpu


def _maxpool_fold_kernel(x_ref, o_ref, *, c, g):
    # x_ref: (TR, G*2*C) — each row holds G groups of [x[b,2i,:], x[b,2i+1,:]]
    # o_ref: (TR, G*C)   — each row holds the G pooled groups
    parts = []
    for k in range(g):
        base = 2 * k * c
        a = x_ref[:, base: base + c]
        b = x_ref[:, base + c: base + 2 * c]
        parts.append(jnp.maximum(a, b))
    o_ref[...] = parts[0] if g == 1 else jnp.concatenate(parts, axis=-1)


def _maxpool_cols_kernel(a_ref, b_ref, o_ref):
    # a_ref/b_ref: (TR, CB) — the two pair halves for one channel block
    o_ref[...] = jnp.maximum(a_ref[...], b_ref[...])


def _round_up(n, m):
    return -(-n // m) * m


def maxpool_forward(x, *, target_block_bytes=8 * 1024 * 1024):
    """MaxPool1d(kernel=2, stride=2) along axis 1: (B, L, C) -> (B, L//2, C)."""
    B, L, C = x.shape
    Lo = L // 2
    if Lo == 0:
        return jnp.zeros((B, 0, C), dtype=x.dtype)
    if L % 2:
        # Materialize the tail-dropping slice only for odd L (even L untouched).
        x = x[:, : 2 * Lo, :]

    rows = B * Lo
    x2 = x.reshape(rows, 2 * C)  # free contiguous view, one output row per pair

    itemsize = jnp.dtype(x.dtype).itemsize
    sub = max(8, 32 // itemsize)              # sublane packing: 8 f32 / 16 bf16 / 32 int8
    vmem_limit = 48 * 1024 * 1024             # safe on v5e/v6e (128 MiB) and v7x (64 MiB)
    cost = pl.CostEstimate(flops=rows * C, transcendentals=0,
                           bytes_accessed=3 * rows * C * itemsize)

    # ---- Guard path: huge 128-aligned C -> tile the channel axis too ----
    if C % 128 == 0 and sub * 2 * C * itemsize > target_block_bytes:
        m = C // 128
        kk = 1
        for cand in range(1, m + 1):
            if m % cand == 0 and sub * 2 * (128 * cand) * itemsize <= target_block_bytes:
                kk = cand
        cb = 128 * kk
        ncb = C // cb
        tr = max(sub, (target_block_bytes // (2 * cb * itemsize)) // sub * sub)
        if rows <= sub:
            tr = rows
        else:
            tr = min(tr, _round_up((rows + 1) // 2, sub))   # >=2 row steps (v7x megacore)
        grid = (pl.cdiv(rows, tr), ncb)
        out2 = pl.pallas_call(
            _maxpool_cols_kernel,
            out_shape=jax.ShapeDtypeStruct((rows, C), x.dtype),
            grid=grid,
            in_specs=[
                pl.BlockSpec((tr, cb), lambda i, j: (i, j)),
                pl.BlockSpec((tr, cb), lambda i, j, _n=ncb: (i, j + _n)),
            ],
            out_specs=pl.BlockSpec((tr, cb), lambda i, j: (i, j)),
            compiler_params=pltpu.CompilerParams(
                dimension_semantics=("parallel", "parallel"),
                vmem_limit_bytes=vmem_limit,
            ),
            cost_estimate=cost,
        )(x2, x2)
        return out2.reshape(B, Lo, C)

    # ---- Main path: fold G row-pairs per block row for lane-dense DMA ----
    if C % 128 == 0:
        G = 1
    else:
        g0 = 128 // math.gcd(C, 128)          # minimal G with (G*C) % 128 == 0
        if rows % g0 == 0:
            G = g0
            while G * C < 512 and rows % (2 * G) == 0:
                G *= 2
        else:
            G = 1   # lane-sparse fallback (still correct, slower for small C)

    rows_g = rows // G
    x3 = x2.reshape(rows_g, G * 2 * C)        # free contiguous view

    row_bytes = G * 2 * C * itemsize
    tr = max(sub, (target_block_bytes // row_bytes) // sub * sub)
    if rows_g <= sub:
        tr = rows_g                            # block == full row extent
    else:
        tr = min(tr, _round_up((rows_g + 1) // 2, sub))   # >=2 grid steps (v7x megacore)

    grid = (pl.cdiv(rows_g, tr),)

    out3 = pl.pallas_call(
        functools.partial(_maxpool_fold_kernel, c=C, g=G),
        out_shape=jax.ShapeDtypeStruct((rows_g, G * C), x.dtype),
        grid=grid,
        in_specs=[pl.BlockSpec((tr, G * 2 * C), lambda i: (i, 0))],
        out_specs=pl.BlockSpec((tr, G * C), lambda i: (i, 0)),
        compiler_params=pltpu.CompilerParams(
            dimension_semantics=("parallel",),
            vmem_limit_bytes=vmem_limit,
        ),
        cost_estimate=cost,
    )(x3)

    return out3.reshape(B, Lo, C)


if __name__ == "__main__":
    key = jax.random.PRNGKey(0)
    B, L, C = 2, 16, 32
    x = jax.random.normal(key, (B, L, C), dtype=jnp.float32)

    out = jax.block_until_ready(maxpool_forward(x))

    # Reference check (pure JAX, mirrors PyTorch MaxPool1d(2) semantics).
    ref = jnp.max(x.reshape(B, L // 2, 2, C), axis=2)
    assert out.shape == (B, L // 2, C), out.shape
    assert jnp.allclose(out, ref), "mismatch vs reference"

    print("KERNEL_OK")
</pallas_src>

<mosaic_0001>
module attributes {stable_mosaic.version = 11 : i64} {
  func.func @_maxpool_fold_kernel(%arg0: i32, %arg1: memref<1x1024xf32, #tpu.memory_space<vmem>>, %arg2: memref<1x512xf32, #tpu.memory_space<vmem>>) attributes {dimension_semantics = [#tpu.dimension_semantics<parallel>], iteration_bounds = array<i64: 1>, scalar_prefetch = 0 : i64, scratch_operands = 0 : i64, tpu.core_type = #tpu.core_type<tc>, window_params = [{transform_indices = @transform_0, window_bounds = array<i64: 1, 1024>}, {transform_indices = @transform_1, window_bounds = array<i64: 1, 512>}]} {
    %c0 = arith.constant 0 : index
    %c0_0 = arith.constant 0 : index
    %0 = vector.load %arg1[%c0, %c0_0] : memref<1x1024xf32, #tpu.memory_space<vmem>>, vector<1x32xf32>
    %c0_1 = arith.constant 0 : index
    %c32 = arith.constant 32 : index
    %1 = vector.load %arg1[%c0_1, %c32] : memref<1x1024xf32, #tpu.memory_space<vmem>>, vector<1x32xf32>
    %2 = arith.maximumf %0, %1 : vector<1x32xf32>
    %c0_2 = arith.constant 0 : index
    %c64 = arith.constant 64 : index
    %3 = vector.load %arg1[%c0_2, %c64] : memref<1x1024xf32, #tpu.memory_space<vmem>>, vector<1x32xf32>
    %c0_3 = arith.constant 0 : index
    %c96 = arith.constant 96 : index
    %4 = vector.load %arg1[%c0_3, %c96] : memref<1x1024xf32, #tpu.memory_space<vmem>>, vector<1x32xf32>
    %5 = arith.maximumf %3, %4 : vector<1x32xf32>
    %c0_4 = arith.constant 0 : index
    %c128 = arith.constant 128 : index
    %6 = vector.load %arg1[%c0_4, %c128] : memref<1x1024xf32, #tpu.memory_space<vmem>>, vector<1x32xf32>
    %c0_5 = arith.constant 0 : index
    %c160 = arith.constant 160 : index
    %7 = vector.load %arg1[%c0_5, %c160] : memref<1x1024xf32, #tpu.memory_space<vmem>>, vector<1x32xf32>
    %8 = arith.maximumf %6, %7 : vector<1x32xf32>
    %c0_6 = arith.constant 0 : index
    %c192 = arith.constant 192 : index
    %9 = vector.load %arg1[%c0_6, %c192] : memref<1x1024xf32, #tpu.memory_space<vmem>>, vector<1x32xf32>
    %c0_7 = arith.constant 0 : index
    %c224 = arith.constant 224 : index
    %10 = vector.load %arg1[%c0_7, %c224] : memref<1x1024xf32, #tpu.memory_space<vmem>>, vector<1x32xf32>
    %11 = arith.maximumf %9, %10 : vector<1x32xf32>
    %c0_8 = arith.constant 0 : index
    %c256 = arith.constant 256 : index
    %12 = vector.load %arg1[%c0_8, %c256] : memref<1x1024xf32, #tpu.memory_space<vmem>>, vector<1x32xf32>
    %c0_9 = arith.constant 0 : index
    %c288 = arith.constant 288 : index
    %13 = vector.load %arg1[%c0_9, %c288] : memref<1x1024xf32, #tpu.memory_space<vmem>>, vector<1x32xf32>
    %14 = arith.maximumf %12, %13 : vector<1x32xf32>
    %c0_10 = arith.constant 0 : index
    %c320 = arith.constant 320 : index
    %15 = vector.load %arg1[%c0_10, %c320] : memref<1x1024xf32, #tpu.memory_space<vmem>>, vector<1x32xf32>
    %c0_11 = arith.constant 0 : index
    %c352 = arith.constant 352 : index
    %16 = vector.load %arg1[%c0_11, %c352] : memref<1x1024xf32, #tpu.memory_space<vmem>>, vector<1x32xf32>
    %17 = arith.maximumf %15, %16 : vector<1x32xf32>
    %c0_12 = arith.constant 0 : index
    %c384 = arith.constant 384 : index
    %18 = vector.load %arg1[%c0_12, %c384] : memref<1x1024xf32, #tpu.memory_space<vmem>>, vector<1x32xf32>
    %c0_13 = arith.constant 0 : index
    %c416 = arith.constant 416 : index
    %19 = vector.load %arg1[%c0_13, %c416] : memref<1x1024xf32, #tpu.memory_space<vmem>>, vector<1x32xf32>
    %20 = arith.maximumf %18, %19 : vector<1x32xf32>
    %c0_14 = arith.constant 0 : index
    %c448 = arith.constant 448 : index
    %21 = vector.load %arg1[%c0_14, %c448] : memref<1x1024xf32, #tpu.memory_space<vmem>>, vector<1x32xf32>
    %c0_15 = arith.constant 0 : index
    %c480 = arith.constant 480 : index
    %22 = vector.load %arg1[%c0_15, %c480] : memref<1x1024xf32, #tpu.memory_space<vmem>>, vector<1x32xf32>
    %23 = arith.maximumf %21, %22 : vector<1x32xf32>
    %c0_16 = arith.constant 0 : index
    %c512 = arith.constant 512 : index
    %24 = vector.load %arg1[%c0_16, %c512] : memref<1x1024xf32, #tpu.memory_space<vmem>>, vector<1x32xf32>
    %c0_17 = arith.constant 0 : index
    %c544 = arith.constant 544 : index
    %25 = vector.load %arg1[%c0_17, %c544] : memref<1x1024xf32, #tpu.memory_space<vmem>>, vector<1x32xf32>
    %26 = arith.maximumf %24, %25 : vector<1x32xf32>
    %c0_18 = arith.constant 0 : index
    %c576 = arith.constant 576 : index
    %27 = vector.load %arg1[%c0_18, %c576] : memref<1x1024xf32, #tpu.memory_space<vmem>>, vector<1x32xf32>
    %c0_19 = arith.constant 0 : index
    %c608 = arith.constant 608 : index
    %28 = vector.load %arg1[%c0_19, %c608] : memref<1x1024xf32, #tpu.memory_space<vmem>>, vector<1x32xf32>
    %29 = arith.maximumf %27, %28 : vector<1x32xf32>
    %c0_20 = arith.constant 0 : index
    %c640 = arith.constant 640 : index
    %30 = vector.load %arg1[%c0_20, %c640] : memref<1x1024xf32, #tpu.memory_space<vmem>>, vector<1x32xf32>
    %c0_21 = arith.constant 0 : index
    %c672 = arith.constant 672 : index
    %31 = vector.load %arg1[%c0_21, %c672] : memref<1x1024xf32, #tpu.memory_space<vmem>>, vector<1x32xf32>
    %32 = arith.maximumf %30, %31 : vector<1x32xf32>
    %c0_22 = arith.constant 0 : index
    %c704 = arith.constant 704 : index
    %33 = vector.load %arg1[%c0_22, %c704] : memref<1x1024xf32, #tpu.memory_space<vmem>>, vector<1x32xf32>
    %c0_23 = arith.constant 0 : index
    %c736 = arith.constant 736 : index
    %34 = vector.load %arg1[%c0_23, %c736] : memref<1x1024xf32, #tpu.memory_space<vmem>>, vector<1x32xf32>
    %35 = arith.maximumf %33, %34 : vector<1x32xf32>
    %c0_24 = arith.constant 0 : index
    %c768 = arith.constant 768 : index
    %36 = vector.load %arg1[%c0_24, %c768] : memref<1x1024xf32, #tpu.memory_space<vmem>>, vector<1x32xf32>
    %c0_25 = arith.constant 0 : index
    %c800 = arith.constant 800 : index
    %37 = vector.load %arg1[%c0_25, %c800] : memref<1x1024xf32, #tpu.memory_space<vmem>>, vector<1x32xf32>
    %38 = arith.maximumf %36, %37 : vector<1x32xf32>
    %c0_26 = arith.constant 0 : index
    %c832 = arith.constant 832 : index
    %39 = vector.load %arg1[%c0_26, %c832] : memref<1x1024xf32, #tpu.memory_space<vmem>>, vector<1x32xf32>
    %c0_27 = arith.constant 0 : index
    %c864 = arith.constant 864 : index
    %40 = vector.load %arg1[%c0_27, %c864] : memref<1x1024xf32, #tpu.memory_space<vmem>>, vector<1x32xf32>
    %41 = arith.maximumf %39, %40 : vector<1x32xf32>
    %c0_28 = arith.constant 0 : index
    %c896 = arith.constant 896 : index
    %42 = vector.load %arg1[%c0_28, %c896] : memref<1x1024xf32, #tpu.memory_space<vmem>>, vector<1x32xf32>
    %c0_29 = arith.constant 0 : index
    %c928 = arith.constant 928 : index
    %43 = vector.load %arg1[%c0_29, %c928] : memref<1x1024xf32, #tpu.memory_space<vmem>>, vector<1x32xf32>
    %44 = arith.maximumf %42, %43 : vector<1x32xf32>
    %c0_30 = arith.constant 0 : index
    %c960 = arith.constant 960 : index
    %45 = vector.load %arg1[%c0_30, %c960] : memref<1x1024xf32, #tpu.memory_space<vmem>>, vector<1x32xf32>
    %c0_31 = arith.constant 0 : index
    %c992 = arith.constant 992 : index
    %46 = vector.load %arg1[%c0_31, %c992] : memref<1x1024xf32, #tpu.memory_space<vmem>>, vector<1x32xf32>
    %47 = arith.maximumf %45, %46 : vector<1x32xf32>
    %48 = tpu.concatenate %2, %5, %8, %11, %14, %17, %20, %23, %26, %29, %32, %35, %38, %41, %44, %47 in 1 : vector<1x32xf32>, vector<1x32xf32>, vector<1x32xf32>, vector<1x32xf32>, vector<1x32xf32>, vector<1x32xf32>, vector<1x32xf32>, vector<1x32xf32>, vector<1x32xf32>, vector<1x32xf32>, vector<1x32xf32>, vector<1x32xf32>, vector<1x32xf32>, vector<1x32xf32>, vector<1x32xf32>, vector<1x32xf32> -> vector<1x512xf32>
    %c0_32 = arith.constant 0 : index
    %c0_33 = arith.constant 0 : index
    %49 = vector.load %arg2[%c0_32, %c0_33] : memref<1x512xf32, #tpu.memory_space<vmem>>, vector<1x512xf32>
    tpu.vector_store %arg2[%c0_32, %c0_33], %48 {strides = array<i32>} : memref<1x512xf32, #tpu.memory_space<vmem>>, vector<1x512xf32>,
    return
  }
  func.func @transform_0(%arg0: i32) -> (i32, i32) {
    %c0_i32 = arith.constant 0 : i32
    %c0_i32_0 = arith.constant 0 : i32
    return %arg0, %c0_i32 : i32, i32
  }
  func.func @transform_1(%arg0: i32) -> (i32, i32) {
    %c0_i32 = arith.constant 0 : i32
    %c0_i32_0 = arith.constant 0 : i32
    return %arg0, %c0_i32 : i32, i32
  }
}

</mosaic_0001>

<bundles_post_ra>
// kernel: tpu_custom_call.1
= control target key start
LH: loop header
LB: loop body
LE: loop exit
PB: predicated region body
PF: predicated region fallthrough
CT: control target
= control target key end

     0   :  { %6 = vsyncpa [#allocation3], 0  ;;  %s276_s0 = inlined_call_operand.hbm [shape: f32[1,1024], index: 0, kind: input, shape index: {}]   ;;  %s277_s1 = inlined_call_operand.hbm [shape: f32[1,512], index: 1, kind: output, shape index: {}]  }
   0x1   :  { %7 = vsyncpa [#allocation4], 0  ;;  %s13_s8 = sshll.u32 %s276_s0, 4  ;;  %s231_s9 = smov [#allocation2]   ;;  %s14_s8 = int_to_ptr.hbm [resolvable:$true] %s13_s8 }
   0x2   :  { %s15_s10 = sshll.u32 %s231_s9, 4  ;;  %s16_s10 = int_to_ptr.vmem [resolvable:$true] %s15_s10 }
   0x3   :  { %18 = dma.hbm_to_vmem [thread:$0]  %s14_s8, 128, %s16_s10, [#allocation3]  }
   0x4   :  { %227 = dma.done.wait [#allocation3], 128  }
   0x5   :  { %228 = vsyncadd [#allocation3], 4294967168  ;;  %v59_v0 = vld [vmem:[#allocation2 + $0x6] sm:$0x1]  ;;  %v35_v1 = vld [vmem:[#allocation2 + $0x2] sm:$0x1]  ;;  %v152_v51 = vlaneseq }
   0x6   :  { %s232_s11 = smov 96   ;;  %v53_v2 = vld [vmem:[#allocation2 + $0x5] sm:$0x1]  ;;  %v41_v3 = vld [vmem:[#allocation2 + $0x3] sm:$0x1]  ;;  %s233_s0 = smov 64  }
   0x7   :  { %61 = vrot.lane.b32.xlu1 %v59_v0, %s232_s11  ;;  %37 = vrot.lane.b32.xlu0 %v35_v1, %s232_s11  ;;  %v47_v4 = vld [vmem:[#allocation2 + $0x4] sm:$0x1]  ;;  %v65_v5 = vld [vmem:[#allocation2 + $0x7] sm:$0x1]  ;;  %v23_v6 = vld [vmem:[#allocation2] sm:$0x1] }
   0x8   :  { %55 = vrot.lane.b32.xlu2 %v53_v2, %s232_s11  ;;  %v29_v7 = vld [vmem:[#allocation2 + $0x1] sm:$0x1]  ;;  %s234_s12 = smov 32   ;;  %vm123_vm0 = vcmask 261120   ;;  %vm125_vm1 = vcmask 523264   ;;  %vm127_vm2 = vcmask 785408  }
   0x9   :  { %vm145_vm3 = vcmask 1040384   ;;  %vm147_vm4 = vcmask 1042434   ;;  %s235_s13 = smov [#allocation5]   ;;  %s164_s17 = sshll.u32 %s277_s1, 4  ;;  %vm149_vm5 = vcmask 1041408   ;;  %vm154_vm6 = vcmp.lt.s32.totalorder %v152_v51, 512  ;;  %s165_s17 = int_to_ptr.hbm [resolvable:$true] %s164_s17 }
   0xa   :  { %s162_s14 = sshll.u32 %s235_s13, 4  ;;  %s163_s14 = int_to_ptr.vmem [resolvable:$true] %s162_s14 }
   0xf   :  { %43 = vrot.lane.b32.xlu1 %v41_v3, %s232_s11  ;;  %49 = vrot.lane.b32.xlu0 %v47_v4, %s232_s11 }
  0x10   :  { %67 = vrot.lane.b32.xlu2 %v65_v5, %s232_s11 }
  0x17   :  { %25 = vrot.lane.b32.xlu0 %v23_v6, %s232_s11  ;;  %31 = vrot.lane.b32.xlu1 %v29_v7, %s232_s11 }
  0x62   :  { %v56_v8 = vpop.permute.xlu2 %55 }
  0x63   :  { %v58_v24 = vmax.f32 %v53_v2, %v56_v8 }
  0x65   :  { %v103_v28 = vperm.slane %v58_v24, 0 }
  0x6a   :  { %v68_v13 = vpop.permute.xlu2 %67 }
  0x6b   :  { %v70_v16 = vmax.f32 %v65_v5, %v68_v13 }
  0x6d   :  { %v116_v19 = vperm.slane %v70_v16, 0 }
  0x79   :  { %v62_v9 = vpop.permute.xlu1 %61  ;;  %v38_v10 = vpop.permute.xlu0 %37 }
  0x7a   :  { %v64_v11 = vmax.f32 %v59_v0, %v62_v9  ;;  %v40_v12 = vmax.f32 %v35_v1, %v38_v10 }
  0x7c   :  { %v111_v14 = vperm.slane %v64_v11, 0  ;;  %v85_v15 = vperm.slane %v40_v12, 0 }
  0x7e   :  { %86 = vrot.lane.b32.xlu2 %v85_v15, %s232_s11  ;;  %112 = vrot.lane.b32.xlu1 %v111_v14, %s232_s11 }
  0x81   :  { %v44_v17 = vpop.permute.xlu1 %43  ;;  %v50_v18 = vpop.permute.xlu0 %49 }
  0x82   :  { %v46_v20 = vmax.f32 %v41_v3, %v44_v17  ;;  %v52_v21 = vmax.f32 %v47_v4, %v50_v18 }
  0x84   :  { %v90_v22 = vperm.slane %v46_v20, 0  ;;  %v98_v23 = vperm.slane %v52_v21, 0 }
  0x86   :  { %91 = vrot.lane.b32.xlu2 %v90_v22, %s233_s0  ;;  %117 = vrot.lane.b32.xlu1 %v116_v19, %s233_s0 }
  0x87   :  { %99 = vrot.lane.b32.xlu0 %v98_v23, %s232_s11 }
  0x89   :  { %v26_v25 = vpop.permute.xlu0 %25  ;;  %v32_v27 = vpop.permute.xlu1 %31 }
  0x8a   :  { %v28_v26 = vmax.f32 %v23_v6, %v26_v25  ;;  %v34_v30 = vmax.f32 %v29_v7, %v32_v27 }
  0x8c   :  { %v72_v29 = vperm.slane %v28_v26, 0  ;;  %v77_v31 = vperm.slane %v34_v30, 0 }
  0x8e   :  { %107 = vrot.lane.b32.xlu1 %v103_v28, %s234_s12  ;;  %73 = vrot.lane.b32.xlu2 %v72_v29, %s232_s11 }
  0x8f   :  { %104 = vrot.lane.b32.xlu0 %v103_v28, %s233_s0 }
  0x96   :  { %120 = vrot.lane.b32.xlu2 %v116_v19, %s234_s12  ;;  %81 = vrot.lane.b32.xlu1 %v77_v31, %s234_s12 }
  0x97   :  { %94 = vrot.lane.b32.xlu0 %v90_v22, %s234_s12 }
  0x9f   :  { %78 = vrot.lane.b32.xlu0 %v77_v31, %s233_s0 }
  0xd8   :  { %v87_v32 = vpop.permute.xlu2 %86 }
  0xd9   :  { %v129_v45 = vsel %vm123_vm0, %v40_v12, %v87_v32 }
  0xe0   :  { %v92_v35 = vpop.permute.xlu2 %91 }
  0xe1   :  { %v130_v47 = vsel %vm125_vm1, %v129_v45, %v92_v35 }
  0xe8   :  { %v74_v38 = vpop.permute.xlu2 %73 }
  0xe9   :  { %v124_v54 = vsel %vm123_vm0, %v28_v26, %v74_v38 }
  0xf0   :  { %v113_v33 = vpop.permute.xlu1 %112  ;;  %v121_v48 = vpop.permute.xlu2 %120 }
  0xf1   :  { %v135_v43 = vsel %vm123_vm0, %v64_v11, %v113_v33 }
  0xf8   :  { %v118_v36 = vpop.permute.xlu1 %117 }
  0xf9   :  { %v100_v34 = vpop.permute.xlu0 %99  ;;  %v136_v44 = vsel %vm125_vm1, %v135_v43, %v118_v36 }
  0xfa   :  { %v132_v40 = vsel %vm123_vm0, %v52_v21, %v100_v34  ;;  %v137_v49 = vsel %vm127_vm2, %v136_v44, %v121_v48 }
  0xfb   :  { %v144_v56 = vrot.slane %v137_v49, 5 }
 0x100   :  { %v108_v39 = vpop.permute.xlu1 %107 }
 0x101   :  { %v105_v37 = vpop.permute.xlu0 %104 }
 0x102   :  { %v133_v42 = vsel %vm125_vm1, %v132_v40, %v105_v37 }
 0x103   :  { %v134_v46 = vsel %vm127_vm2, %v133_v42, %v108_v39 }
 0x104   :  { %v143_v52 = vrot.slane %v134_v46, 6 }
 0x106   :  { %v148_v61 = vsel %vm147_vm4, %v143_v52, %v144_v56 }
 0x108   :  { %v82_v53 = vpop.permute.xlu1 %81 }
 0x109   :  { %v95_v41 = vpop.permute.xlu0 %94 }
 0x10a   :  { %v131_v50 = vsel %vm127_vm2, %v130_v47, %v95_v41 }
 0x10b   :  { %v142_v57 = vrot.slane %v131_v50, 7 }
 0x111   :  { %v79_v55 = vpop.permute.xlu0 %78 }
 0x112   :  { %v126_v58 = vsel %vm125_vm1, %v124_v54, %v79_v55 }
 0x113   :  { %v128_v59 = vsel %vm127_vm2, %v126_v58, %v82_v53 }
 0x114   :  { %v146_v60 = vsel %vm145_vm3, %v128_v59, %v142_v57 }
 0x115   :  { %v150_v62 = vsel %vm149_vm5, %v146_v60, %v148_v61 }
 0x116   :  { %156 = vst.msk [vmem:[#allocation5] sm:$0xf] %vm154_vm6, %v150_v62 }
 0x117   :  { %167 = dma.vmem_to_hbm [thread:$0]  %s163_s14, 64, %s165_s17, [#allocation4]  }
 0x118   :  { %229 = dma.done.wait [#allocation4], 64  }
 0x119   :  { %230 = vsyncadd [#allocation4], 4294967232 }
 0x11a   :  { %172 = vsyncpa [#allocation3], 1 }
 0x11b   :  { %173 = vsyncpa [#allocation4], 1 }

</bundles_post_ra>
